<compile_context>
chip_gen: v5e
topology: v5e:2x2
jax: 0.10.0
libtpu: 0.0.40
codegen_flags: <defaults>
</compile_context>

<pallas_src>
import math

import jax
import jax.numpy as jnp
from jax import lax
from jax.experimental import pallas as pl
from jax.experimental.pallas import tpu as pltpu


# VMEM budgets: v7x has 64 MiB per TensorCore; leave headroom for Mosaic's
# internal scratch and the double-buffered pipeline. (v5e/v6e have 128 MiB.)
_VMEM_LIMIT_BYTES = 40 * 1024 * 1024
_ATTN_TILE_BUDGET = 28 * 1024 * 1024


def _pick_tile(dim, candidates):
    """Largest candidate that divides `dim`, else the full axis (full-dim
    blocks are exempt from the (8,128) tiling rule)."""
    for t in candidates:
        if dim % t == 0:
            return t
    return dim


# ----------------------------------------------------------------------------
# Scaled dot-product attention kernels
# ----------------------------------------------------------------------------

def _make_flash_sdpa_kernel(*, n_head, d_k, d_v, scale, has_mask):
    """Online-softmax (flash) kernel. Grid = (B, Lq//TQ, Lk//TK). All heads are
    processed inside the kernel, so q/k/v stay in (B, L, H*d) layout (no HBM
    head transposes) and the output store is lane-dense over H*d_v."""

    def kernel(*refs):
        if has_mask:
            q_ref, k_ref, v_ref, mask_ref, o_ref, m_scr, l_scr, acc_scr = refs
        else:
            q_ref, k_ref, v_ref, o_ref, m_scr, l_scr, acc_scr = refs
            mask_ref = None

        ki = pl.program_id(2)
        nk = pl.num_programs(2)

        @pl.when(ki == 0)
        def _init():
            m_scr[...] = jnp.full_like(m_scr, -jnp.inf)
            l_scr[...] = jnp.zeros_like(l_scr)
            acc_scr[...] = jnp.zeros_like(acc_scr)

        # Mask is (B, Lq, Lk): shared across heads, loaded once per tile.
        neg = (mask_ref[0] == 0) if has_mask else None          # (TQ, TK) bool

        for h in range(n_head):
            # Per-head lane slices of the (B, L, H*d) projection layout.
            q_h = q_ref[0, :, h * d_k:(h + 1) * d_k] * scale    # fold 1/temperature
            k_h = k_ref[0, :, h * d_k:(h + 1) * d_k]
            v_h = v_ref[0, :, h * d_v:(h + 1) * d_v]

            # q @ k^T: contract last axes directly (no k transpose copy);
            # operands stay in the input dtype, f32 accumulation on the MXU.
            s = lax.dot_general(
                q_h, k_h,
                dimension_numbers=(((1,), (1,)), ((), ())),
                preferred_element_type=jnp.float32)             # (TQ, TK) f32
            if has_mask:
                s = jnp.where(neg, jnp.float32(-1e9), s)

            m_prev = m_scr[h]                                   # (TQ, 1)
            m_new = jnp.maximum(m_prev, jnp.max(s, axis=-1, keepdims=True))
            alpha = jnp.exp(m_prev - m_new)
            p = jnp.exp(s - m_new)                              # unnormalized
            l_scr[h] = alpha * l_scr[h] + jnp.sum(p, axis=-1, keepdims=True)
            acc_scr[h] = alpha * acc_scr[h] + jnp.dot(
                p.astype(v_h.dtype), v_h, preferred_element_type=jnp.float32)
            m_scr[h] = m_new

        @pl.when(ki == nk - 1)
        def _finalize():
            # Deferred normalization: out = (sum_k e @ v) * (1 / l).
            for h in range(n_head):
                inv = pl.reciprocal(l_scr[h], approx=False)     # keep exact numerics
                o_ref[0, :, h * d_v:(h + 1) * d_v] = (
                    acc_scr[h] * inv).astype(o_ref.dtype)

    return kernel


def _make_full_sdpa_kernel(*, n_head, d_k, d_v, scale, has_mask):
    """Full-Lk kernel, used only when the normalized attention matrix is
    explicitly requested (return_attn=True). Grid = (B, Lq//TQ)."""

    def kernel(*refs):
        q_ref, k_ref, v_ref = refs[0], refs[1], refs[2]
        pos = 3
        mask_ref = None
        if has_mask:
            mask_ref = refs[pos]
            pos += 1
        o_ref, attn_ref = refs[pos], refs[pos + 1]

        neg = (mask_ref[0] == 0) if has_mask else None          # (TQ, Lk)

        for h in range(n_head):
            q_h = q_ref[0, :, h * d_k:(h + 1) * d_k] * scale
            k_h = k_ref[0, :, h * d_k:(h + 1) * d_k]
            v_h = v_ref[0, :, h * d_v:(h + 1) * d_v]

            s = lax.dot_general(
                q_h, k_h,
                dimension_numbers=(((1,), (1,)), ((), ())),
                preferred_element_type=jnp.float32)             # (TQ, Lk) f32
            if has_mask:
                s = jnp.where(neg, jnp.float32(-1e9), s)

            m = jnp.max(s, axis=-1, keepdims=True)
            e = jnp.exp(s - m)
            inv = pl.reciprocal(jnp.sum(e, axis=-1, keepdims=True), approx=False)
            attn = e * inv                                      # (TQ, Lk) f32

            out_h = jnp.dot(attn.astype(v_h.dtype), v_h,
                            preferred_element_type=jnp.float32)  # (TQ, d_v)
            o_ref[0, :, h * d_v:(h + 1) * d_v] = out_h.astype(o_ref.dtype)
            attn_ref[0, h] = attn.astype(attn_ref.dtype)

    return kernel


def _choose_flash_tiles(lq, lk, d_qk_all, d_v_all, n_head, d_v, itemsize, has_mask):
    """Pick (TQ, TK) so that the double-buffered blocks + scratch fit the VMEM
    budget (critical on v7x's 64 MiB TensorCore)."""
    tq_cands = [t for t in (256, 128) if lq % t == 0] or [lq]
    tk_cands = [t for t in (512, 256, 128) if lk % t == 0] or [lk]

    def footprint(tq, tk):
        b = 2 * (tq * d_qk_all + tk * d_qk_all + tk * d_v_all) * itemsize  # in (2x buf)
        b += 2 * tq * d_v_all * itemsize                                   # out block
        if has_mask:
            b += 2 * tq * tk                                               # int8 mask
        b += n_head * tq * (d_v + 2) * 4                                   # acc + m + l
        b += 3 * tq * tk * 4                                               # s/p temporaries
        return b

    for tq in tq_cands:
        for tk in tk_cands:
            if footprint(tq, tk) <= _ATTN_TILE_BUDGET:
                return tq, tk
    # TODO(synk): for very large H*d_k even the minimum tiles exceed the budget;
    # fall back to the smallest candidates and rely on vmem_limit_bytes.
    return tq_cands[-1], tk_cands[-1]


def scaled_dot_product_attention(q, k, v, *, n_head, d_k, d_v, temperature,
                                 mask=None, return_attn=False,
                                 tile_q=None, tile_k=None):
    """q: (B, Lq, H*d_k), k: (B, Lk, H*d_k), v: (B, Lk, H*d_v) — heads live in
    the last dim (projection layout: head h at columns [h*d, (h+1)*d)).
    mask: optional (B, Lq, Lk), 0 = masked out.
    Returns (output (B, Lq, H*d_v), attn (B, H, Lq, Lk) or None)."""
    B, Lq, Dqk = q.shape
    Lk = k.shape[1]
    Dv = v.shape[2]
    assert Dqk == n_head * d_k and Dv == n_head * d_v
    assert v.shape[1] == Lk

    scale = 1.0 / float(temperature)
    out_dtype = q.dtype
    itemsize = jnp.dtype(out_dtype).itemsize
    has_mask = mask is not None

    args = [q, k, v]
    if has_mask:
        # (B, Lq, Lk) int8, shared across heads inside the kernel (no H-way
        # broadcast, 4x smaller DMA than int32).
        args.append(jnp.broadcast_to(mask, (B, Lq, Lk)).astype(jnp.int8))

    flops = 2 * B * n_head * Lq * Lk * (d_k + d_v)
    trans = B * n_head * Lq * Lk
    base_bytes = (q.size * q.dtype.itemsize + k.size * k.dtype.itemsize
                  + v.size * v.dtype.itemsize + B * Lq * Dv * itemsize
                  + (B * Lq * Lk if has_mask else 0))

    if not return_attn:
        # Flash path: key-tiled online softmax, no attention-matrix writeback.
        TQ, TK = _choose_flash_tiles(Lq, Lk, Dqk, Dv, n_head, d_v,
                                     itemsize, has_mask)
        if tile_q is not None:
            TQ = tile_q
        if tile_k is not None:
            TK = tile_k
        assert Lq % TQ == 0 and Lk % TK == 0

        in_specs = [
            pl.BlockSpec((1, TQ, Dqk), lambda b, qi, ki: (b, qi, 0)),
            pl.BlockSpec((1, TK, Dqk), lambda b, qi, ki: (b, ki, 0)),
            pl.BlockSpec((1, TK, Dv), lambda b, qi, ki: (b, ki, 0)),
        ]
        if has_mask:
            in_specs.append(
                pl.BlockSpec((1, TQ, TK), lambda b, qi, ki: (b, qi, ki)))

        out = pl.pallas_call(
            _make_flash_sdpa_kernel(n_head=n_head, d_k=d_k, d_v=d_v,
                                    scale=scale, has_mask=has_mask),
            out_shape=jax.ShapeDtypeStruct((B, Lq, Dv), out_dtype),
            grid=(B, Lq // TQ, Lk // TK),
            in_specs=in_specs,
            out_specs=pl.BlockSpec((1, TQ, Dv), lambda b, qi, ki: (b, qi, 0)),
            scratch_shapes=[
                pltpu.VMEM((n_head, TQ, 1), jnp.float32),    # running max
                pltpu.VMEM((n_head, TQ, 1), jnp.float32),    # running denom
                pltpu.VMEM((n_head, TQ, d_v), jnp.float32),  # running numerator
            ],
            compiler_params=pltpu.CompilerParams(
                dimension_semantics=("parallel", "parallel", "arbitrary"),
                vmem_limit_bytes=_VMEM_LIMIT_BYTES),
            cost_estimate=pl.CostEstimate(flops=flops, transcendentals=trans,
                                          bytes_accessed=base_bytes),
        )(*args)
        return out, None

    # return_attn=True: full-Lk variant (memory-heavy attn writeback; opt-in).
    TQ = tile_q if tile_q is not None else _pick_tile(Lq, (256, 128))
    assert Lq % TQ == 0

    in_specs = [
        pl.BlockSpec((1, TQ, Dqk), lambda b, qi: (b, qi, 0)),
        pl.BlockSpec((1, Lk, Dqk), lambda b, qi: (b, 0, 0)),
        pl.BlockSpec((1, Lk, Dv), lambda b, qi: (b, 0, 0)),
    ]
    if has_mask:
        in_specs.append(pl.BlockSpec((1, TQ, Lk), lambda b, qi: (b, qi, 0)))

    out, attn = pl.pallas_call(
        _make_full_sdpa_kernel(n_head=n_head, d_k=d_k, d_v=d_v,
                               scale=scale, has_mask=has_mask),
        out_shape=(jax.ShapeDtypeStruct((B, Lq, Dv), out_dtype),
                   jax.ShapeDtypeStruct((B, n_head, Lq, Lk), out_dtype)),
        grid=(B, Lq // TQ),
        in_specs=in_specs,
        out_specs=(pl.BlockSpec((1, TQ, Dv), lambda b, qi: (b, qi, 0)),
                   pl.BlockSpec((1, n_head, TQ, Lk), lambda b, qi: (b, 0, qi, 0))),
        compiler_params=pltpu.CompilerParams(
            dimension_semantics=("parallel", "parallel"),
            vmem_limit_bytes=_VMEM_LIMIT_BYTES),
        cost_estimate=pl.CostEstimate(
            flops=flops, transcendentals=trans,
            bytes_accessed=base_bytes + B * n_head * Lq * Lk * itemsize),
    )(*args)
    return out, attn


# ----------------------------------------------------------------------------
# Tiled linear projection (M/N/K tiled, f32 accumulator, fused residual)
# ----------------------------------------------------------------------------

def _matmul_kernel(x_ref, w_ref, o_ref, acc_ref):
    @pl.when(pl.program_id(2) == 0)
    def _init():
        acc_ref[...] = jnp.zeros_like(acc_ref)

    acc_ref[...] += jnp.dot(x_ref[...], w_ref[...],
                            preferred_element_type=jnp.float32)

    @pl.when(pl.program_id(2) == pl.num_programs(2) - 1)
    def _store():
        o_ref[...] = acc_ref[...].astype(o_ref.dtype)


def _matmul_residual_kernel(x_ref, w_ref, r_ref, o_ref, acc_ref):
    @pl.when(pl.program_id(2) == 0)
    def _init():
        acc_ref[...] = jnp.zeros_like(acc_ref)

    acc_ref[...] += jnp.dot(x_ref[...], w_ref[...],
                            preferred_element_type=jnp.float32)

    @pl.when(pl.program_id(2) == pl.num_programs(2) - 1)
    def _store():
        o_ref[...] = (acc_ref[...] + r_ref[...].astype(jnp.float32)
                      ).astype(o_ref.dtype)


def pallas_linear(x, w, residual=None, *, out_dtype=None,
                  tile_m=None, tile_n=None, tile_k=None):
    """x: (M, K) @ w: (K, N) (+ residual (M, N)). N-tiling keeps each weight
    block small (no whole-weight VMEM residency) and output stores lane-dense;
    the K axis is a reduction ('arbitrary') with an f32 accumulator."""
    M, K = x.shape
    N = w.shape[1]
    out_dtype = out_dtype or x.dtype
    tm = tile_m or _pick_tile(M, (512, 256, 128))
    tn = tile_n or _pick_tile(N, (512, 256, 128))
    tk = tile_k or _pick_tile(K, (1024, 512, 256, 128))
    # TODO(synk): if K has no 128-multiple divisor and is very large, the
    # full-K blocks may exceed VMEM; add padded K tiling for that case.

    in_specs = [pl.BlockSpec((tm, tk), lambda i, j, kk: (i, kk)),
                pl.BlockSpec((tk, tn), lambda i, j, kk: (kk, j))]
    args = [x, w]
    if residual is not None:
        in_specs.append(pl.BlockSpec((tm, tn), lambda i, j, kk: (i, j)))
        args.append(residual)
        kernel = _matmul_residual_kernel
    else:
        kernel = _matmul_kernel

    return pl.pallas_call(
        kernel,
        out_shape=jax.ShapeDtypeStruct((M, N), out_dtype),
        grid=(M // tm, N // tn, K // tk),
        in_specs=in_specs,
        out_specs=pl.BlockSpec((tm, tn), lambda i, j, kk: (i, j)),
        scratch_shapes=[pltpu.VMEM((tm, tn), jnp.float32)],
        compiler_params=pltpu.CompilerParams(
            dimension_semantics=("parallel", "parallel", "arbitrary"),
            vmem_limit_bytes=_VMEM_LIMIT_BYTES),
    )(*args)


# ----------------------------------------------------------------------------
# MultiHeadAttention forward
# ----------------------------------------------------------------------------

def multi_head_attention(q, k, v, params, *, n_head, d_k, d_v, mask=None,
                         return_attn=False, compute_dtype=None,
                         attn_tile_q=None, attn_tile_k=None):
    """Forward of the PyTorch MultiHeadAttention module (eval mode).
    q/k/v: (B, L, d_model). Returns (output, attn); attn is None unless
    return_attn=True (the (B,H,Lq,Lk) writeback is the dominant HBM stream,
    so it is opt-in — pass return_attn=True for exact module parity)."""
    B, Lq, d_model = q.shape
    Lk = k.shape[1]
    assert v.shape[1] == Lk
    residual = q
    out_dtype = q.dtype

    self_attn = (q is k) and (k is v)

    w_qs, w_ks, w_vs, w_fc = params["w_qs"], params["w_ks"], params["w_vs"], params["fc"]
    if compute_dtype is not None:
        # bf16 operands with f32 accumulation for the v6e/v7x 256-wide MXU.
        q = q.astype(compute_dtype)
        k = k.astype(compute_dtype)
        v = v.astype(compute_dtype)
        w_qs = w_qs.astype(compute_dtype)
        w_ks = w_ks.astype(compute_dtype)
        w_vs = w_vs.astype(compute_dtype)
        w_fc = w_fc.astype(compute_dtype)

    if self_attn:
        # Fused QKV projection: read x from HBM once, one pipeline warm-up.
        # (In production, pre-concatenate the weights once at init time.)
        w_qkv = jnp.concatenate([w_qs, w_ks, w_vs], axis=1)
        qkv = pallas_linear(q.reshape(B * Lq, d_model), w_qkv)
        hk = n_head * d_k
        qp = qkv[:, :hk]
        kp = qkv[:, hk:2 * hk]
        vp = qkv[:, 2 * hk:]
    else:
        qp = pallas_linear(q.reshape(B * Lq, d_model), w_qs)
        kp = pallas_linear(k.reshape(B * Lk, d_model), w_ks)
        vp = pallas_linear(v.reshape(B * Lk, d_model), w_vs)

    # Keep the (B, L, H*d) projection layout: the attention kernel picks heads
    # with lane slices, so there are no HBM (B,L,H,d)->(B,H,L,d) transposes and
    # the score writeback is a lane-dense (B, Lq, H*d_v) slab (matches the
    # PyTorch head-concat layout exactly).
    qp = qp.reshape(B, Lq, n_head * d_k)
    kp = kp.reshape(B, Lk, n_head * d_k)
    vp = vp.reshape(B, Lk, n_head * d_v)

    score, attn = scaled_dot_product_attention(
        qp, kp, vp, n_head=n_head, d_k=d_k, d_v=d_v,
        temperature=d_k ** 0.5, mask=mask, return_attn=return_attn,
        tile_q=attn_tile_q, tile_k=attn_tile_k)

    # fc + residual fused in one kernel; dropout is identity at inference.
    # TODO(synk): training-mode dropout (RNG) is not implemented.
    out = pallas_linear(score.reshape(B * Lq, n_head * d_v), w_fc,
                        residual=residual.reshape(B * Lq, d_model),
                        out_dtype=out_dtype)
    return out.reshape(B, Lq, d_model), attn


# ----------------------------------------------------------------------------
# Pure-JAX reference for validation
# ----------------------------------------------------------------------------

def _reference_mha(q, k, v, params, *, n_head, d_k, d_v, mask=None):
    B, Lq, d_model = q.shape
    Lk = k.shape[1]
    qp = (q @ params["w_qs"]).reshape(B, Lq, n_head, d_k).transpose(0, 2, 1, 3)
    kp = (k @ params["w_ks"]).reshape(B, Lk, n_head, d_k).transpose(0, 2, 1, 3)
    vp = (v @ params["w_vs"]).reshape(B, Lk, n_head, d_v).transpose(0, 2, 1, 3)
    attn = jnp.matmul(qp, jnp.swapaxes(kp, -2, -1)) / (d_k ** 0.5)
    if mask is not None:
        attn = jnp.where(mask[:, None, :, :] == 0, -1e9, attn)
    attn = jax.nn.softmax(attn, axis=-1)
    score = jnp.matmul(attn, vp)
    concat = score.transpose(0, 2, 1, 3).reshape(B, Lq, n_head * d_v)
    out = concat @ params["fc"] + q
    return out, attn


# ----------------------------------------------------------------------------
# Self-test
# ----------------------------------------------------------------------------

if __name__ == "__main__":
    key = jax.random.PRNGKey(0)
    B, L, d_model = 2, 16, 32
    n_head, d_k, d_v = 4, 16, 16

    keys = jax.random.split(key, 8)
    x = jax.random.normal(keys[0], (B, L, d_model), dtype=jnp.float32)
    k_in = jax.random.normal(keys[1], (B, L, d_model), dtype=jnp.float32)
    v_in = jax.random.normal(keys[2], (B, L, d_model), dtype=jnp.float32)

    s = 1.0 / math.sqrt(d_model)
    params = {
        "w_qs": jax.random.normal(keys[3], (d_model, n_head * d_k), jnp.float32) * s,
        "w_ks": jax.random.normal(keys[4], (d_model, n_head * d_k), jnp.float32) * s,
        "w_vs": jax.random.normal(keys[5], (d_model, n_head * d_v), jnp.float32) * s,
        "fc":   jax.random.normal(keys[6], (n_head * d_v, d_model), jnp.float32) * s,
    }
    # deterministic causal mask, shape (B, Lq, Lk); 0 = masked out
    causal = jnp.broadcast_to(
        jnp.tril(jnp.ones((L, L), dtype=jnp.int32))[None, :, :], (B, L, L))

    # 1) self-attention, no mask, flash path with a multi-step online softmax
    #    (tile overrides give 2x2 q/k tiles) + fused QKV projection.
    out1, attn1 = multi_head_attention(x, x, x, params,
                                       n_head=n_head, d_k=d_k, d_v=d_v,
                                       mask=None, return_attn=False,
                                       attn_tile_q=8, attn_tile_k=8)
    out1 = jax.block_until_ready(out1)
    ref1, _ = _reference_mha(x, x, x, params, n_head=n_head, d_k=d_k, d_v=d_v)
    assert attn1 is None
    assert jnp.allclose(out1, ref1, atol=2e-4, rtol=2e-4), "mismatch: self-attn flash"

    # 2) self-attention, causal mask, flash path (default full tiles).
    out2, _ = multi_head_attention(x, x, x, params,
                                   n_head=n_head, d_k=d_k, d_v=d_v,
                                   mask=causal, return_attn=False)
    out2 = jax.block_until_ready(out2)
    ref2, _ = _reference_mha(x, x, x, params, n_head=n_head, d_k=d_k, d_v=d_v,
                             mask=causal)
    assert jnp.allclose(out2, ref2, atol=2e-4, rtol=2e-4), "mismatch: masked flash"

    # 3) cross-attention, mask, attention matrix requested (full-Lk kernel).
    out3, attn3 = multi_head_attention(x, k_in, v_in, params,
                                       n_head=n_head, d_k=d_k, d_v=d_v,
                                       mask=causal, return_attn=True)
    out3, attn3 = jax.block_until_ready((out3, attn3))
    ref3, refattn3 = _reference_mha(x, k_in, v_in, params,
                                    n_head=n_head, d_k=d_k, d_v=d_v, mask=causal)
    assert jnp.allclose(out3, ref3, atol=2e-4, rtol=2e-4), "mismatch: cross-attn out"
    assert jnp.allclose(attn3, refattn3, atol=2e-4, rtol=2e-4), "mismatch: cross-attn attn"

    # 4) bf16 compute path (f32 accumulation) — loose tolerance.
    out4, _ = multi_head_attention(x, x, x, params,
                                   n_head=n_head, d_k=d_k, d_v=d_v,
                                   mask=causal, return_attn=False,
                                   compute_dtype=jnp.bfloat16)
    out4 = jax.block_until_ready(out4)
    assert jnp.allclose(out4.astype(jnp.float32), ref2, atol=1e-1, rtol=1e-1), \
        "mismatch: bf16 path"

    print("KERNEL_OK")
</pallas_src>

<mosaic_0001>
module attributes {stable_mosaic.version = 11 : i64} {
  func.func @_matmul_kernel(%arg0: i32, %arg1: i32, %arg2: i32, %arg3: memref<32x32xf32, #tpu.memory_space<vmem>>, %arg4: memref<32x192xf32, #tpu.memory_space<vmem>>, %arg5: memref<32x192xf32, #tpu.memory_space<vmem>>, %arg6: memref<32x192xf32, #tpu.memory_space<vmem>>) attributes {dimension_semantics = [#tpu.dimension_semantics<parallel>, #tpu.dimension_semantics<parallel>, #tpu.dimension_semantics<arbitrary>], iteration_bounds = array<i64: 1, 1, 1>, scalar_prefetch = 0 : i64, scratch_operands = 1 : i64, tpu.core_type = #tpu.core_type<tc>, window_params = [{transform_indices = @transform_0, window_bounds = array<i64: 32, 32>}, {transform_indices = @transform_1, window_bounds = array<i64: 32, 192>}, {transform_indices = @transform_2, window_bounds = array<i64: 32, 192>}]} {
    %c0_i32 = arith.constant 0 : i32
    %0 = arith.cmpi eq, %arg2, %c0_i32 : i32
    %1 = arith.extui %0 : i1 to i32
    %c0_i32_0 = arith.constant 0 : i32
    %2 = arith.cmpi ne, %1, %c0_i32_0 : i32
    scf.if %2 {
      %cst_10 = arith.constant 0.000000e+00 : f32
      %12 = vector.broadcast %cst_10 : f32 to vector<32x192xf32>
      %c0_11 = arith.constant 0 : index
      %c0_12 = arith.constant 0 : index
      %13 = vector.load %arg6[%c0_11, %c0_12] : memref<32x192xf32, #tpu.memory_space<vmem>>, vector<32x192xf32>
      tpu.vector_store %arg6[%c0_11, %c0_12], %12 {strides = array<i32>} : memref<32x192xf32, #tpu.memory_space<vmem>>, vector<32x192xf32>,
    } else {
    }
    %c0 = arith.constant 0 : index
    %c0_1 = arith.constant 0 : index
    %3 = vector.load %arg6[%c0, %c0_1] : memref<32x192xf32, #tpu.memory_space<vmem>>, vector<32x192xf32>
    %c0_2 = arith.constant 0 : index
    %c0_3 = arith.constant 0 : index
    %4 = vector.load %arg3[%c0_2, %c0_3] : memref<32x32xf32, #tpu.memory_space<vmem>>, vector<32x32xf32>
    %c0_4 = arith.constant 0 : index
    %c0_5 = arith.constant 0 : index
    %5 = vector.load %arg4[%c0_4, %c0_5] : memref<32x192xf32, #tpu.memory_space<vmem>>, vector<32x192xf32>
    %cst = arith.constant dense<0.000000e+00> : vector<32x192xf32>
    %6 = tpu.matmul %4, %5, %cst {dimension_numbers = #tpu.dot_dimension_numbers<[1], [0], [0], [1], [0, 0, 1, 1], [], []>} : vector<32x32xf32>, vector<32x192xf32>, vector<32x192xf32> -> vector<32x192xf32>
    %7 = arith.addf %3, %6 : vector<32x192xf32>
    %c0_6 = arith.constant 0 : index
    %c0_7 = arith.constant 0 : index
    %8 = vector.load %arg6[%c0_6, %c0_7] : memref<32x192xf32, #tpu.memory_space<vmem>>, vector<32x192xf32>
    tpu.vector_store %arg6[%c0_6, %c0_7], %7 {strides = array<i32>} : memref<32x192xf32, #tpu.memory_space<vmem>>, vector<32x192xf32>,
    %c0_i32_8 = arith.constant 0 : i32
    %9 = arith.cmpi eq, %arg2, %c0_i32_8 : i32
    %10 = arith.extui %9 : i1 to i32
    %c0_i32_9 = arith.constant 0 : i32
    %11 = arith.cmpi ne, %10, %c0_i32_9 : i32
    scf.if %11 {
      %c0_10 = arith.constant 0 : index
      %c0_11 = arith.constant 0 : index
      %12 = vector.load %arg6[%c0_10, %c0_11] : memref<32x192xf32, #tpu.memory_space<vmem>>, vector<32x192xf32>
      %c0_12 = arith.constant 0 : index
      %c0_13 = arith.constant 0 : index
      %13 = vector.load %arg5[%c0_12, %c0_13] : memref<32x192xf32, #tpu.memory_space<vmem>>, vector<32x192xf32>
      tpu.vector_store %arg5[%c0_12, %c0_13], %12 {strides = array<i32>} : memref<32x192xf32, #tpu.memory_space<vmem>>, vector<32x192xf32>,
    } else {
    }
    return
  }
  func.func @transform_0(%arg0: i32, %arg1: i32, %arg2: i32) -> (i32, i32) {
    %c0_i32 = arith.constant 0 : i32
    return %arg0, %arg2 : i32, i32
  }
  func.func @transform_1(%arg0: i32, %arg1: i32, %arg2: i32) -> (i32, i32) {
    %c0_i32 = arith.constant 0 : i32
    return %arg2, %arg1 : i32, i32
  }
  func.func @transform_2(%arg0: i32, %arg1: i32, %arg2: i32) -> (i32, i32) {
    %c0_i32 = arith.constant 0 : i32
    return %arg0, %arg1 : i32, i32
  }
}

</mosaic_0001>

<bundles_post_ra>
// kernel: tpu_custom_call.1
= control target key start
LH: loop header
LB: loop body
LE: loop exit
PB: predicated region body
PF: predicated region fallthrough
CT: control target
= control target key end

     0   :  { %7 = vsyncpa [#allocation4], 0  ;;  %s364_s0 = inlined_call_operand.hbm [shape: f32[32,32], index: 0, kind: input, shape index: {}]   ;;  %s365_s1 = inlined_call_operand.hbm [shape: f32[32,192], index: 1, kind: input, shape index: {}]   ;;  %s366_s2 = inlined_call_operand.hbm [shape: f32[32,192], index: 2, kind: output, shape index: {}]  }
   0x1   :  { %8 = vsyncpa [#allocation7], 0 }
   0x2   :  { %9 = vsyncpa [#allocation5], 0  ;;  %s14_s11 = sshll.u32 %s364_s0, 4  ;;  %s306_s12 = smov [#allocation3]   ;;  %s15_s11 = int_to_ptr.hbm [resolvable:$true] %s14_s11 }
   0x3   :  { %s16_s13 = sshll.u32 %s306_s12, 4  ;;  %s27_s16 = sshll.u32 %s365_s1, 4  ;;  %s17_s13 = int_to_ptr.vmem [resolvable:$true] %s16_s13  ;;  %s28_s16 = int_to_ptr.hbm [resolvable:$true] %s27_s16 }
   0x4   :  { %s307_s17 = smov 128   ;;  %s308_s18 = smov 8  }
   0x5   :  { %22 = dma.hbm_to_vmem [thread:$0]  %s15_s11, 512, %s17_s13, [#allocation4], %s307_s17, %s307_s17, %s308_s18  }
   0x6   :  { %s309_s19 = smov [#allocation6]   ;;  %s310_s21 = smov 256  }
   0x7   :  { %s29_s20 = sshll.u32 %s309_s19, 4  ;;  %s311_s22 = smov 16   ;;  %s30_s20 = int_to_ptr.vmem [resolvable:$true] %s29_s20 }
   0x8   :  { %35 = dma.hbm_to_vmem [thread:$0]  %s28_s16, 1024, %s30_s20, [#allocation7], %s310_s21, %s310_s21, %s311_s22  }
   0x9   :  { %300 = dma.done.wait [#allocation4], 512  }
   0xa   :  { %301 = vsyncadd [#allocation4], 4294966784 }
   0xb   :  { %302 = dma.done.wait [#allocation7], 1024  }
   0xc   :  { %303 = vsyncadd [#allocation7], 4294966272  ;;  %v75_v0 = vld [vmem:[#allocation6 + $0x30] sm:$0xff]  ;;  %v76_v1 = vld [vmem:[#allocation6 + $0x38] sm:$0xff]  ;;  %vm77_vm0 = vcmask 261120   ;;  %vm49_vm1 = vcmask 523264  }
   0xd   :  { %v73_v2 = vld [vmem:[#allocation6 + $0x20] sm:$0xff]  ;;  %212 = vmatpush.msra.mxu2 %v75_v0  ;;  %216 = vmatpush.msra.mxu3 %v76_v1  ;;  %v74_v3 = vld [vmem:[#allocation6 + $0x28] sm:$0xff]  ;;  %v71_v4 = vld [vmem:[#allocation6 + $0x10] sm:$0xff]  ;;  %v312_v12 = vmov 0.0   ;;  %s313_s0 = smov [#allocation8]   ;;  %s190_s25 = sshll.u32 %s366_s2, 4  ;;  %s191_s25 = int_to_ptr.hbm [resolvable:$true] %s190_s25 }
   0xe   :  { %v72_v5 = vld [vmem:[#allocation6 + $0x18] sm:$0xff]  ;;  %102 = vmatpush.msra.mxu0 %v75_v0  ;;  %131 = vmatpush.msra.mxu1 %v76_v1  ;;  %v69_v6 = vld [vmem:[#allocation6] sm:$0xff]  ;;  %v70_v7 = vld [vmem:[#allocation6 + $0x8] sm:$0xff]  ;;  %50 = vst.msk [vmem:[#allocation2 + $0x8] sm:$0xff] %vm49_vm1, %v312_v12  ;;  %s188_s1 = sshll.u32 %s313_s0, 4  ;;  %s189_s1 = int_to_ptr.vmem [resolvable:$true] %s188_s1 }
   0xf   :  { %213 = vmatpush.msra.mxu2 %v73_v2  ;;  %217 = vmatpush.msra.mxu3 %v74_v3  ;;  %v67_v8 = vld [vmem:[#allocation3 + $0x10] sm:$0xff]  ;;  %v65_v9 = vld [vmem:[#allocation3] sm:$0xff]  ;;  %v68_v10 = vld [vmem:[#allocation3 + $0x18] sm:$0xff]  ;;  %52 = vst.msk [vmem:[#allocation2 + $0x18] sm:$0xff] %vm49_vm1, %v312_v12 }
  0x10   :  { %103 = vmatpush.msra.mxu0 %v73_v2  ;;  %132 = vmatpush.msra.mxu1 %v74_v3  ;;  %v66_v11 = vld [vmem:[#allocation3 + $0x8] sm:$0xff]  ;;  %54 = vst.msk [vmem:[#allocation2 + $0x28] sm:$0xff] %vm49_vm1, %v312_v12 }
  0x11   :  { %214 = vmatpush.msra.mxu2 %v71_v4  ;;  %218 = vmatpush.msra.mxu3 %v72_v5  ;;  %56 = vst.msk [vmem:[#allocation2 + $0x38] sm:$0xff] %vm49_vm1, %v312_v12 }
  0x12   :  { %104 = vmatpush.msra.mxu0 %v71_v4  ;;  %133 = vmatpush.msra.mxu1 %v72_v5 }
  0x13   :  { %215 = vmatpush.msra.mxu2 %v69_v6  ;;  %219 = vmatpush.msra.mxu3 %v70_v7 }
  0x14   :  { %206 = vmatmul.msk.f32.vlgmr.msra.gmra.mxu2 %vm77_vm0, %v67_v8  ;;  %210 = vmatmul.msk.f32.vlgmr.msra.gmra.mxu3 %vm77_vm0, %v67_v8 }
  0x15   :  { %105 = vmatpush.msra.mxu0 %v69_v6  ;;  %134 = vmatpush.msra.mxu1 %v70_v7  ;;  %v58_v13 = vld [vmem:[#allocation2 + $0x8] sm:$0xff] }
  0x16   :  { %204 = vmatmul.msk.f32.vlgmr.msra.gmra.mxu0 %vm77_vm0, %v65_v9  ;;  %208 = vmatmul.msk.f32.vlgmr.msra.gmra.mxu1 %vm77_vm0, %v65_v9  ;;  %v60_v21 = vld [vmem:[#allocation2 + $0x18] sm:$0xff] }
  0x17   :  { %v62_v17 = vld [vmem:[#allocation2 + $0x28] sm:$0xff] }
  0x18   :  { %v64_v25 = vld [vmem:[#allocation2 + $0x38] sm:$0xff] }
  0x1c   :  { %207 = vmatmul.msk.f32.gmra.mxu2 %vm77_vm0, %v68_v10  ;;  %211 = vmatmul.msk.f32.gmra.mxu3 %vm77_vm0, %v68_v10 }
  0x1e   :  { %205 = vmatmul.msk.f32.gmra.mxu0 %vm77_vm0, %v66_v11  ;;  %209 = vmatmul.msk.f32.gmra.mxu1 %vm77_vm0, %v66_v11 }
  0x93   :  { %v107_v14 = vpop.f32.mrf.mxu0  ;;  %v136_v15 = vpop.f32.mrf.mxu1 }
  0x94   :  { %v149_v16 = vadd.f32 %v136_v15, %v58_v13  ;;  %176 = vst [vmem:[#allocation8] sm:$0xff] %v107_v14 }
  0x96   :  { %158 = vst.msk [vmem:[#allocation2 + $0x8] sm:$0xff] %vm49_vm1, %v149_v16 }
  0x97   :  { %v113_v18 = vpop.f32.mrf.mxu2  ;;  %v142_v19 = vpop.f32.mrf.mxu3 }
  0x98   :  { %v153_v20 = vadd.f32 %v142_v19, %v62_v17  ;;  %180 = vst [vmem:[#allocation8 + $0x20] sm:$0xff] %v113_v18 }
  0x9a   :  { %162 = vst.msk [vmem:[#allocation2 + $0x28] sm:$0xff] %vm49_vm1, %v153_v20 }
  0x9b   :  { %v110_v22 = vpop.f32.mrf.mxu0  ;;  %v139_v23 = vpop.f32.mrf.mxu1 }
  0x9c   :  { %v151_v24 = vadd.f32 %v139_v23, %v60_v21  ;;  %178 = vst [vmem:[#allocation8 + $0x10] sm:$0xff] %v110_v22 }
  0x9d   :  { %v169_v26 = vld [vmem:[#allocation2 + $0x8] sm:$0xff] }
  0x9e   :  { %160 = vst.msk [vmem:[#allocation2 + $0x18] sm:$0xff] %vm49_vm1, %v151_v24 }
  0x9f   :  { %v116_v27 = vpop.f32.mrf.mxu2  ;;  %v145_v28 = vpop.f32.mrf.mxu3  ;;  %177 = vst.msk [vmem:[#allocation8 + $0x8] sm:$0xff] %vm49_vm1, %v169_v26 }
  0xa0   :  { %v155_v29 = vadd.f32 %v145_v28, %v64_v25  ;;  %182 = vst [vmem:[#allocation8 + $0x30] sm:$0xff] %v116_v27 }
  0xa1   :  { %v173_v30 = vld [vmem:[#allocation2 + $0x28] sm:$0xff] }
  0xa2   :  { %164 = vst.msk [vmem:[#allocation2 + $0x38] sm:$0xff] %vm49_vm1, %v155_v29 }
  0xa3   :  { %181 = vst.msk [vmem:[#allocation8 + $0x28] sm:$0xff] %vm49_vm1, %v173_v30 }
  0xa5   :  { %v171_v31 = vld [vmem:[#allocation2 + $0x18] sm:$0xff] }
  0xa6   :  { %179 = vst.msk [vmem:[#allocation8 + $0x18] sm:$0xff] %vm49_vm1, %v171_v31 }
  0xa9   :  { %v175_v32 = vld [vmem:[#allocation2 + $0x38] sm:$0xff] }
  0xaa   :  { %183 = vst.msk [vmem:[#allocation8 + $0x38] sm:$0xff] %vm49_vm1, %v175_v32 }
  0xab   :  { %196 = dma.vmem_to_hbm [thread:$0]  %s189_s1, 1024, %s191_s25, [#allocation5], %s310_s21, %s310_s21, %s311_s22  }
  0xac   :  { %304 = dma.done.wait [#allocation5], 1024  }
  0xad   :  { %305 = vsyncadd [#allocation5], 4294966272 }
  0xae   :  { %201 = vsyncpa [#allocation4], 1 }
  0xaf   :  { %202 = vsyncpa [#allocation7], 1 }
  0xb0   :  { %203 = vsyncpa [#allocation5], 1 }

</bundles_post_ra>
